<compile_context>
chip_gen: v5e
topology: v5e:2x2
jax: 0.10.0
libtpu: 0.0.40
codegen_flags: <defaults>
</compile_context>

<pallas_src>
import math
import functools

import jax
import jax.numpy as jnp
from jax.experimental import pallas as pl
from jax.experimental.pallas import tpu as pltpu


def _pick_tile(dim, target, align):
    """Largest divisor of `dim` that is <= target and a multiple of `align`.
    Falls back to the full dimension (always a legal block size)."""
    if dim <= target:
        return dim
    for cand in range(target, align - 1, -1):
        if dim % cand == 0 and cand % align == 0:
            return cand
    return dim


_VMEM_CAP = 64 << 20      # v7x physical VMEM per TensorCore; safe ceiling on all gens.
_VMEM_MARGIN = 16 << 20   # headroom for relayouts / compiler temporaries.


# -----------------------------------------------------------------------------
# Kernel 1: dense linear layer  y = x @ W^T + b  (tiled, pipelined)
# -----------------------------------------------------------------------------
def _linear_kernel(x_ref, w_ref, b_ref, o_ref, acc_ref):
    k = pl.program_id(2)

    @pl.when(k == 0)
    def _():
        acc_ref[...] = jnp.zeros_like(acc_ref)

    # x tile (tm, tk) bf16 @ w tile (tk, tn) bf16 -> f32 accumulate on MXU.
    acc_ref[...] += jnp.dot(x_ref[...], w_ref[...],
                            preferred_element_type=jnp.float32)

    @pl.when(k == pl.num_programs(2) - 1)
    def _():
        o_ref[...] = (acc_ref[...] + b_ref[...]).astype(o_ref.dtype)


def linear_pallas(x2d, w, b, *, out_dtype=jnp.float32,
                  tm_target=512, tn_target=512, tk_target=2048):
    """x2d: (M, Din), w: (Dout, Din) [PyTorch layout], b: (Dout,) -> (M, Dout)."""
    M, Din = x2d.shape
    Dout = w.shape[0]

    # bf16 operands for the MXU; weight pre-transposed once on the host side.
    x_bf = x2d.astype(jnp.bfloat16)
    wt_bf = w.T.astype(jnp.bfloat16)                 # (Din, Dout)
    b2d = b.reshape(1, Dout).astype(jnp.float32)

    tm = _pick_tile(M, tm_target, 16)                # bf16 vreg packs (16, 128)
    tn = _pick_tile(Dout, tn_target, 128)
    tk = _pick_tile(Din, tk_target, 128)

    out_bytes = jnp.dtype(out_dtype).itemsize
    vmem = 2 * (tm * tk * 2 + tk * tn * 2 + tn * 4 + tm * tn * out_bytes)
    vmem += tm * tn * 4                              # f32 accumulator scratch
    vmem = min(vmem + _VMEM_MARGIN, _VMEM_CAP)

    return pl.pallas_call(
        _linear_kernel,
        out_shape=jax.ShapeDtypeStruct((M, Dout), out_dtype),
        grid_spec=pltpu.PrefetchScalarGridSpec(
            num_scalar_prefetch=0,
            grid=(M // tm, Dout // tn, Din // tk),
            in_specs=[
                pl.BlockSpec((tm, tk), lambda i, j, k: (i, k)),
                pl.BlockSpec((tk, tn), lambda i, j, k: (k, j)),
                pl.BlockSpec((1, tn), lambda i, j, k: (0, j)),
            ],
            out_specs=pl.BlockSpec((tm, tn), lambda i, j, k: (i, j)),
            scratch_shapes=[pltpu.VMEM((tm, tn), jnp.float32)],
        ),
        compiler_params=pltpu.CompilerParams(
            dimension_semantics=("parallel", "parallel", "arbitrary"),
            vmem_limit_bytes=vmem),
    )(x_bf, wt_bf, b2d)


# -----------------------------------------------------------------------------
# Kernel 2: multi-head scaled dot-product attention (flash-style, online softmax)
#   grid = (batch, q-tile, kv-tile); all heads processed inside one grid step so
#   the output block is the lane-dense head-concatenated (B, S, H*dvh) tensor
#   written exactly once per (b, q-tile).
# -----------------------------------------------------------------------------
def _attn_kernel(q_ref, k_ref, v_ref, m_ref, o_ref,
                 m_sc, l_sc, acc_sc, *, n_heads):
    j = pl.program_id(2)

    @pl.when(j == 0)
    def _():
        m_sc[...] = jnp.full_like(m_sc, -jnp.inf)
        l_sc[...] = jnp.zeros_like(l_sc)
        acc_sc[...] = jnp.zeros_like(acc_sc)

    q = q_ref[0]                      # (tq,  KD) bf16 -- already scaled via W_q
    k = k_ref[0]                      # (tkv, KD) bf16
    v = v_ref[0]                      # (tkv, VD) bf16
    keep = m_ref[0] != 0              # (tq, tkv) -- masked_fill(mask == 0, -1e9)

    dkh = q.shape[-1] // n_heads
    dvh = v.shape[-1] // n_heads

    for h in range(n_heads):          # static unroll over heads
        qh = q[:, h * dkh:(h + 1) * dkh]
        kh = k[:, h * dkh:(h + 1) * dkh]
        vh = v[:, h * dvh:(h + 1) * dvh]

        # scores = qh @ kh^T (contract feature dim of both; no transpose op).
        s = jax.lax.dot_general(
            qh, kh, (((1,), (1,)), ((), ())),
            preferred_element_type=jnp.float32)
        s = jnp.where(keep, s, jnp.float32(-1e9))

        # Online softmax update (unnormalized running accumulator).
        m_prev = m_sc[h]                                        # (tq, 1)
        m_new = jnp.maximum(m_prev, jnp.max(s, axis=-1, keepdims=True))
        alpha = jnp.exp(m_prev - m_new)                         # (tq, 1)
        p = jnp.exp(s - m_new)                                  # (tq, tkv)

        l_sc[h] = alpha * l_sc[h] + jnp.sum(p, axis=-1, keepdims=True)
        acc_sc[h] = alpha * acc_sc[h] + jnp.dot(
            p.astype(jnp.bfloat16), vh, preferred_element_type=jnp.float32)
        m_sc[h] = m_new

    @pl.when(j == pl.num_programs(2) - 1)
    def _():
        # Deferred normalization: per-head (tq, dvh) multiply instead of the
        # (tq, S) probability matrix; heads concatenated so the store is one
        # lane-dense (tq, VD) write per grid step.
        parts = []
        for h in range(n_heads):
            inv = pl.reciprocal(l_sc[h], approx=True)           # (tq, 1)
            parts.append(acc_sc[h] * inv)                       # (tq, dvh)
        o_ref[0] = jnp.concatenate(parts, axis=-1).astype(o_ref.dtype)


def attention_pallas(q, k, v, mask_i8, n_heads, *, out_dtype=jnp.bfloat16,
                     tq_target=256, tkv_target=512):
    """q,k: (B,S,KD), v: (B,S,VD), mask_i8: (B,S,S) int8 -> (B,S,VD) head-concat."""
    B, S, KD = q.shape
    VD = v.shape[-1]
    dvh = VD // n_heads

    tq = _pick_tile(S, tq_target, 16)      # bf16 sublane packing
    tkv = _pick_tile(S, tkv_target, 128)   # kv tile is the lane dim of scores/mask

    # VMEM budget: double-buffered q/k/v/mask/out blocks + m/l/acc scratch
    # (lane-padded) + live f32 score temporaries, with headroom, capped at the
    # v7x physical 64 MiB.
    vmem = 2 * (tq * KD * 2 + tkv * KD * 2 + tkv * VD * 2 + tq * tkv + tq * VD * 2)
    vmem += 4 * n_heads * tq * (128 + 128 + max(dvh, 128))
    vmem += 6 * tq * tkv * 4
    vmem = min(vmem + _VMEM_MARGIN, _VMEM_CAP)

    kern = functools.partial(_attn_kernel, n_heads=n_heads)
    return pl.pallas_call(
        kern,
        out_shape=jax.ShapeDtypeStruct((B, S, VD), out_dtype),
        grid_spec=pltpu.PrefetchScalarGridSpec(
            num_scalar_prefetch=0,
            grid=(B, S // tq, S // tkv),
            in_specs=[
                pl.BlockSpec((1, tq, KD), lambda b, i, j: (b, i, 0)),
                pl.BlockSpec((1, tkv, KD), lambda b, i, j: (b, j, 0)),
                pl.BlockSpec((1, tkv, VD), lambda b, i, j: (b, j, 0)),
                pl.BlockSpec((1, tq, tkv), lambda b, i, j: (b, i, j)),
            ],
            out_specs=pl.BlockSpec((1, tq, VD), lambda b, i, j: (b, i, 0)),
            scratch_shapes=[
                pltpu.VMEM((n_heads, tq, 1), jnp.float32),    # running max m
                pltpu.VMEM((n_heads, tq, 1), jnp.float32),    # running sum l
                pltpu.VMEM((n_heads, tq, dvh), jnp.float32),  # running acc
            ],
        ),
        # B * (S//tq) parallel grid points feed v7x's 2 TensorCores; the kv
        # axis is the sequential (accumulating) one.
        compiler_params=pltpu.CompilerParams(
            dimension_semantics=("parallel", "parallel", "arbitrary"),
            vmem_limit_bytes=vmem),
    )(q, k, v, mask_i8)


# -----------------------------------------------------------------------------
# MultiHeadAttention forward (matches the PyTorch module semantics)
# -----------------------------------------------------------------------------
def init_params(key, model_dim, key_dim, value_dim):
    """Deterministic init mimicking nn.Linear default (uniform +/- 1/sqrt(fan_in))."""
    def linear_init(k, dout, din):
        k1, k2 = jax.random.split(k)
        bound = 1.0 / math.sqrt(din)
        w = jax.random.uniform(k1, (dout, din), jnp.float32, -bound, bound)
        b = jax.random.uniform(k2, (dout,), jnp.float32, -bound, bound)
        return w, b

    k1, k2, k3, k4 = jax.random.split(key, 4)
    return {
        "w_q": linear_init(k1, key_dim, model_dim),
        "w_k": linear_init(k2, key_dim, model_dim),
        "w_v": linear_init(k3, value_dim, model_dim),
        "w_o": linear_init(k4, model_dim, value_dim),
    }


def multi_head_attention(params, queries, keys, values, masks, *,
                         model_dim, key_dim, value_dim, n_heads):
    B, S, _ = queries.shape
    scale = 1.0 / math.sqrt(key_dim // n_heads)

    # Fold the 1/sqrt(d_head) softmax scale into the query projection (free).
    w_q, b_q = params["w_q"]
    q = linear_pallas(queries.reshape(B * S, model_dim), w_q * scale, b_q * scale,
                      out_dtype=jnp.bfloat16).reshape(B, S, key_dim)
    k = linear_pallas(keys.reshape(B * S, model_dim), *params["w_k"],
                      out_dtype=jnp.bfloat16).reshape(B, S, key_dim)
    v = linear_pallas(values.reshape(B * S, model_dim), *params["w_v"],
                      out_dtype=jnp.bfloat16).reshape(B, S, value_dim)

    # int8 mask: 4x less HBM/DMA/VMEM than the f32 mask.
    mask_i8 = (masks != 0).astype(jnp.int8)

    # Attention over all heads at once; output already equals
    # torch.cat(attentions, dim=-1): (B, S, value_dim), lane-dense.
    att = attention_pallas(q, k, v, mask_i8, n_heads)

    # Faithfully reproduce the module's .transpose(1, 2).contiguous().view(...)
    # re-interleave (it scrambles seq/feature; kept for exact parity).
    att = att.transpose(0, 2, 1).reshape(B, S, value_dim)

    # Final output projection (Pallas tiled matmul kernel), f32 output.
    out = linear_pallas(att.reshape(B * S, value_dim), *params["w_o"],
                        out_dtype=jnp.float32)
    return out.reshape(B, S, model_dim)


if __name__ == "__main__":
    # Small deterministic example: batch=2, seq=8, model_dim=32, heads=4.
    B, S = 2, 8
    MODEL_DIM, KEY_DIM, VALUE_DIM, N_HEADS = 32, 32, 32, 4

    root = jax.random.PRNGKey(0)
    kp, kq, kk, kv = jax.random.split(root, 4)

    params = init_params(kp, MODEL_DIM, KEY_DIM, VALUE_DIM)
    queries = jax.random.normal(kq, (B, S, MODEL_DIM), jnp.float32)
    keys = jax.random.normal(kk, (B, S, MODEL_DIM), jnp.float32)
    values = jax.random.normal(kv, (B, S, MODEL_DIM), jnp.float32)
    # Causal mask (1 = attend, 0 = masked), shape (B, S, S).
    masks = jnp.broadcast_to(
        jnp.tril(jnp.ones((S, S), jnp.float32)), (B, S, S)
    )

    fwd = jax.jit(functools.partial(
        multi_head_attention,
        model_dim=MODEL_DIM, key_dim=KEY_DIM,
        value_dim=VALUE_DIM, n_heads=N_HEADS))

    out = fwd(params, queries, keys, values, masks)
    jax.block_until_ready(out)
    assert out.shape == (B, S, MODEL_DIM) and out.dtype == jnp.float32
    print("KERNEL_OK")
</pallas_src>

<mosaic_0001>
module attributes {stable_mosaic.version = 11 : i64} {
  func.func @_linear_kernel(%arg0: i32, %arg1: i32, %arg2: i32, %arg3: memref<16x32xbf16, #tpu.memory_space<vmem>>, %arg4: memref<32x32xbf16, #tpu.memory_space<vmem>>, %arg5: memref<1x32xf32, #tpu.memory_space<vmem>>, %arg6: memref<16x32xbf16, #tpu.memory_space<vmem>>, %arg7: memref<16x32xf32, #tpu.memory_space<vmem>>) attributes {dimension_semantics = [#tpu.dimension_semantics<parallel>, #tpu.dimension_semantics<parallel>, #tpu.dimension_semantics<arbitrary>], iteration_bounds = array<i64: 1, 1, 1>, scalar_prefetch = 0 : i64, scratch_operands = 1 : i64, tpu.core_type = #tpu.core_type<tc>, window_params = [{transform_indices = @transform_0, window_bounds = array<i64: 16, 32>}, {transform_indices = @transform_1, window_bounds = array<i64: 32, 32>}, {transform_indices = @transform_2, window_bounds = array<i64: 1, 32>}, {transform_indices = @transform_3, window_bounds = array<i64: 16, 32>}]} {
    %c0_i32 = arith.constant 0 : i32
    %0 = arith.cmpi eq, %arg2, %c0_i32 : i32
    %1 = arith.extui %0 : i1 to i32
    %c0_i32_0 = arith.constant 0 : i32
    %2 = arith.cmpi ne, %1, %c0_i32_0 : i32
    scf.if %2 {
      %cst_10 = arith.constant 0.000000e+00 : f32
      %12 = vector.broadcast %cst_10 : f32 to vector<16x32xf32>
      %c0_11 = arith.constant 0 : index
      %c0_12 = arith.constant 0 : index
      %13 = vector.load %arg7[%c0_11, %c0_12] : memref<16x32xf32, #tpu.memory_space<vmem>>, vector<16x32xf32>
      tpu.vector_store %arg7[%c0_11, %c0_12], %12 {strides = array<i32>} : memref<16x32xf32, #tpu.memory_space<vmem>>, vector<16x32xf32>,
    } else {
    }
    %c0 = arith.constant 0 : index
    %c0_1 = arith.constant 0 : index
    %3 = vector.load %arg7[%c0, %c0_1] : memref<16x32xf32, #tpu.memory_space<vmem>>, vector<16x32xf32>
    %c0_2 = arith.constant 0 : index
    %c0_3 = arith.constant 0 : index
    %4 = vector.load %arg3[%c0_2, %c0_3] : memref<16x32xbf16, #tpu.memory_space<vmem>>, vector<16x32xbf16>
    %c0_4 = arith.constant 0 : index
    %c0_5 = arith.constant 0 : index
    %5 = vector.load %arg4[%c0_4, %c0_5] : memref<32x32xbf16, #tpu.memory_space<vmem>>, vector<32x32xbf16>
    %cst = arith.constant dense<0.000000e+00> : vector<16x32xf32>
    %6 = tpu.matmul %4, %5, %cst {dimension_numbers = #tpu.dot_dimension_numbers<[1], [0], [0], [1], [0, 0, 1, 1], [], []>} : vector<16x32xbf16>, vector<32x32xbf16>, vector<16x32xf32> -> vector<16x32xf32>
    %7 = arith.addf %3, %6 : vector<16x32xf32>
    %c0_6 = arith.constant 0 : index
    %c0_7 = arith.constant 0 : index
    %8 = vector.load %arg7[%c0_6, %c0_7] : memref<16x32xf32, #tpu.memory_space<vmem>>, vector<16x32xf32>
    tpu.vector_store %arg7[%c0_6, %c0_7], %7 {strides = array<i32>} : memref<16x32xf32, #tpu.memory_space<vmem>>, vector<16x32xf32>,
    %c0_i32_8 = arith.constant 0 : i32
    %9 = arith.cmpi eq, %arg2, %c0_i32_8 : i32
    %10 = arith.extui %9 : i1 to i32
    %c0_i32_9 = arith.constant 0 : i32
    %11 = arith.cmpi ne, %10, %c0_i32_9 : i32
    scf.if %11 {
      %c0_10 = arith.constant 0 : index
      %c0_11 = arith.constant 0 : index
      %12 = vector.load %arg7[%c0_10, %c0_11] : memref<16x32xf32, #tpu.memory_space<vmem>>, vector<16x32xf32>
      %c0_12 = arith.constant 0 : index
      %c0_13 = arith.constant 0 : index
      %13 = vector.load %arg5[%c0_12, %c0_13] : memref<1x32xf32, #tpu.memory_space<vmem>>, vector<1x32xf32>
      %14 = vector.broadcast %13 : vector<1x32xf32> to vector<16x32xf32>
      %15 = arith.addf %12, %14 : vector<16x32xf32>
      %16 = arith.truncf %15 : vector<16x32xf32> to vector<16x32xbf16>
      %c0_14 = arith.constant 0 : index
      %c0_15 = arith.constant 0 : index
      %17 = vector.load %arg6[%c0_14, %c0_15] : memref<16x32xbf16, #tpu.memory_space<vmem>>, vector<16x32xbf16>
      tpu.vector_store %arg6[%c0_14, %c0_15], %16 {strides = array<i32>} : memref<16x32xbf16, #tpu.memory_space<vmem>>, vector<16x32xbf16>,
    } else {
    }
    return
  }
  func.func @transform_0(%arg0: i32, %arg1: i32, %arg2: i32) -> (i32, i32) {
    %c0_i32 = arith.constant 0 : i32
    return %arg0, %arg2 : i32, i32
  }
  func.func @transform_1(%arg0: i32, %arg1: i32, %arg2: i32) -> (i32, i32) {
    %c0_i32 = arith.constant 0 : i32
    return %arg2, %arg1 : i32, i32
  }
  func.func @transform_2(%arg0: i32, %arg1: i32, %arg2: i32) -> (i32, i32) {
    %c0_i32 = arith.constant 0 : i32
    %c0_i32_0 = arith.constant 0 : i32
    return %c0_i32, %arg1 : i32, i32
  }
  func.func @transform_3(%arg0: i32, %arg1: i32, %arg2: i32) -> (i32, i32) {
    %c0_i32 = arith.constant 0 : i32
    return %arg0, %arg1 : i32, i32
  }
}

module attributes {stable_mosaic.version = 11 : i64} {
  func.func @_attn_kernel(%arg0: i32, %arg1: i32, %arg2: i32, %arg3: memref<1x8x32xbf16, #tpu.memory_space<vmem>>, %arg4: memref<1x8x32xbf16, #tpu.memory_space<vmem>>, %arg5: memref<1x8x32xbf16, #tpu.memory_space<vmem>>, %arg6: memref<1x8x8xi8, #tpu.memory_space<vmem>>, %arg7: memref<1x8x32xbf16, #tpu.memory_space<vmem>>, %arg8: memref<4x8x1xf32, #tpu.memory_space<vmem>>, %arg9: memref<4x8x1xf32, #tpu.memory_space<vmem>>, %arg10: memref<4x8x8xf32, #tpu.memory_space<vmem>>) attributes {dimension_semantics = [#tpu.dimension_semantics<parallel>, #tpu.dimension_semantics<parallel>, #tpu.dimension_semantics<arbitrary>], iteration_bounds = array<i64: 2, 1, 1>, scalar_prefetch = 0 : i64, scratch_operands = 3 : i64, tpu.core_type = #tpu.core_type<tc>, window_params = [{transform_indices = @transform_0, window_bounds = array<i64: 1, 8, 32>}, {transform_indices = @transform_1, window_bounds = array<i64: 1, 8, 32>}, {transform_indices = @transform_2, window_bounds = array<i64: 1, 8, 32>}, {transform_indices = @transform_3, window_bounds = array<i64: 1, 8, 8>}, {transform_indices = @transform_4, window_bounds = array<i64: 1, 8, 32>}]} {
    %c0_i32 = arith.constant 0 : i32
    %0 = arith.cmpi eq, %arg2, %c0_i32 : i32
    %1 = arith.extui %0 : i1 to i32
    %c0_i32_0 = arith.constant 0 : i32
    %2 = arith.cmpi ne, %1, %c0_i32_0 : i32
    scf.if %2 {
      %cst_102 = arith.constant 0xFF800000 : f32
      %168 = vector.broadcast %cst_102 : f32 to vector<4x8x1xf32>
      %c0_103 = arith.constant 0 : index
      %c0_104 = arith.constant 0 : index
      %c0_105 = arith.constant 0 : index
      %169 = vector.load %arg8[%c0_103, %c0_104, %c0_105] : memref<4x8x1xf32, #tpu.memory_space<vmem>>, vector<4x8x1xf32>
      tpu.vector_store %arg8[%c0_103, %c0_104, %c0_105], %168 {strides = array<i32>} : memref<4x8x1xf32, #tpu.memory_space<vmem>>, vector<4x8x1xf32>,
      %cst_106 = arith.constant 0.000000e+00 : f32
      %170 = vector.broadcast %cst_106 : f32 to vector<4x8x1xf32>
      %c0_107 = arith.constant 0 : index
      %c0_108 = arith.constant 0 : index
      %c0_109 = arith.constant 0 : index
      %171 = vector.load %arg9[%c0_107, %c0_108, %c0_109] : memref<4x8x1xf32, #tpu.memory_space<vmem>>, vector<4x8x1xf32>
      tpu.vector_store %arg9[%c0_107, %c0_108, %c0_109], %170 {strides = array<i32>} : memref<4x8x1xf32, #tpu.memory_space<vmem>>, vector<4x8x1xf32>,
      %cst_110 = arith.constant 0.000000e+00 : f32
      %172 = vector.broadcast %cst_110 : f32 to vector<4x8x8xf32>
      %c0_111 = arith.constant 0 : index
      %c0_112 = arith.constant 0 : index
      %c0_113 = arith.constant 0 : index
      %173 = vector.load %arg10[%c0_111, %c0_112, %c0_113] : memref<4x8x8xf32, #tpu.memory_space<vmem>>, vector<4x8x8xf32>
      tpu.vector_store %arg10[%c0_111, %c0_112, %c0_113], %172 {strides = array<i32>} : memref<4x8x8xf32, #tpu.memory_space<vmem>>, vector<4x8x8xf32>,
    } else {
    }
    %c0 = arith.constant 0 : index
    %c0_1 = arith.constant 0 : index
    %c0_2 = arith.constant 0 : index
    %3 = vector.load %arg3[%c0, %c0_1, %c0_2] : memref<1x8x32xbf16, #tpu.memory_space<vmem>>, vector<1x8x32xbf16>
    %4 = vector.shape_cast %3 : vector<1x8x32xbf16> to vector<8x32xbf16>
    %c0_3 = arith.constant 0 : index
    %c0_4 = arith.constant 0 : index
    %c0_5 = arith.constant 0 : index
    %5 = vector.load %arg4[%c0_3, %c0_4, %c0_5] : memref<1x8x32xbf16, #tpu.memory_space<vmem>>, vector<1x8x32xbf16>
    %6 = vector.shape_cast %5 : vector<1x8x32xbf16> to vector<8x32xbf16>
    %c0_6 = arith.constant 0 : index
    %c0_7 = arith.constant 0 : index
    %c0_8 = arith.constant 0 : index
    %7 = vector.load %arg5[%c0_6, %c0_7, %c0_8] : memref<1x8x32xbf16, #tpu.memory_space<vmem>>, vector<1x8x32xbf16>
    %8 = vector.shape_cast %7 : vector<1x8x32xbf16> to vector<8x32xbf16>
    %c0_9 = arith.constant 0 : index
    %c0_10 = arith.constant 0 : index
    %c0_11 = arith.constant 0 : index
    %9 = vector.load %arg6[%c0_9, %c0_10, %c0_11] : memref<1x8x8xi8, #tpu.memory_space<vmem>>, vector<1x8x8xi8>
    %10 = vector.shape_cast %9 : vector<1x8x8xi8> to vector<8x8xi8>
    %c0_i8 = arith.constant 0 : i8
    %11 = vector.broadcast %c0_i8 : i8 to vector<8x8xi8>
    %12 = arith.cmpi ne, %10, %11 : vector<8x8xi8>
    %13 = vector.extract_strided_slice %4 {offsets = [0, 0], sizes = [8, 8], strides = [1, 1]} : vector<8x32xbf16> to vector<8x8xbf16>
    %14 = vector.extract_strided_slice %6 {offsets = [0, 0], sizes = [8, 8], strides = [1, 1]} : vector<8x32xbf16> to vector<8x8xbf16>
    %15 = vector.extract_strided_slice %8 {offsets = [0, 0], sizes = [8, 8], strides = [1, 1]} : vector<8x32xbf16> to vector<8x8xbf16>
    %cst = arith.constant dense<0.000000e+00> : vector<8x8xf32>
    %16 = tpu.matmul %13, %14, %cst {dimension_numbers = #tpu.dot_dimension_numbers<[1], [1], [0], [0], [0, 0, 1, 0], [], []>} : vector<8x8xbf16>, vector<8x8xbf16>, vector<8x8xf32> -> vector<8x8xf32>
    %cst_12 = arith.constant -1.000000e+09 : f32
    %17 = vector.broadcast %cst_12 : f32 to vector<8x8xf32>
    %18 = arith.select %12, %16, %17 : vector<8x8xi1>, vector<8x8xf32>
    %c0_13 = arith.constant 0 : index
    %c0_14 = arith.constant 0 : index
    %c0_15 = arith.constant 0 : index
    %19 = vector.load %arg8[%c0_13, %c0_14, %c0_15] : memref<4x8x1xf32, #tpu.memory_space<vmem>>, vector<1x8x1xf32>
    %20 = vector.shape_cast %19 : vector<1x8x1xf32> to vector<8x1xf32>
    %cst_16 = arith.constant dense<0xFF800000> : vector<8xf32>
    %21 = vector.multi_reduction <maximumf>, %18, %cst_16 [1] : vector<8x8xf32> to vector<8xf32>
    %22 = vector.shape_cast %21 : vector<8xf32> to vector<8x1xf32>
    %23 = arith.maximumf %20, %22 : vector<8x1xf32>
    %24 = arith.subf %20, %23 : vector<8x1xf32>
    %25 = math.exp %24 : vector<8x1xf32>
    %26 = vector.broadcast %23 : vector<8x1xf32> to vector<8x8xf32>
    %27 = arith.subf %18, %26 : vector<8x8xf32>
    %28 = math.exp %27 : vector<8x8xf32>
    %c0_17 = arith.constant 0 : index
    %c0_18 = arith.constant 0 : index
    %c0_19 = arith.constant 0 : index
    %29 = vector.load %arg9[%c0_17, %c0_18, %c0_19] : memref<4x8x1xf32, #tpu.memory_space<vmem>>, vector<1x8x1xf32>
    %30 = vector.shape_cast %29 : vector<1x8x1xf32> to vector<8x1xf32>
    %31 = arith.mulf %25, %30 : vector<8x1xf32>
    %cst_20 = arith.constant dense<0.000000e+00> : vector<8xf32>
    %32 = vector.multi_reduction <add>, %28, %cst_20 [1] : vector<8x8xf32> to vector<8xf32>
    %33 = vector.shape_cast %32 : vector<8xf32> to vector<8x1xf32>
    %34 = arith.addf %31, %33 : vector<8x1xf32>
    %c0_21 = arith.constant 0 : index
    %c0_22 = arith.constant 0 : index
    %c0_23 = arith.constant 0 : index
    %35 = vector.load %arg9[%c0_21, %c0_22, %c0_23] : memref<4x8x1xf32, #tpu.memory_space<vmem>>, vector<1x8x1xf32>
    %36 = vector.shape_cast %35 : vector<1x8x1xf32> to vector<8x1xf32>
    %37 = vector.shape_cast %34 : vector<8x1xf32> to vector<1x8x1xf32>
    tpu.vector_store %arg9[%c0_21, %c0_22, %c0_23], %37 {strides = array<i32>} : memref<4x8x1xf32, #tpu.memory_space<vmem>>, vector<1x8x1xf32>,
    %c0_24 = arith.constant 0 : index
    %c0_25 = arith.constant 0 : index
    %c0_26 = arith.constant 0 : index
    %38 = vector.load %arg10[%c0_24, %c0_25, %c0_26] : memref<4x8x8xf32, #tpu.memory_space<vmem>>, vector<1x8x8xf32>
    %39 = vector.shape_cast %38 : vector<1x8x8xf32> to vector<8x8xf32>
    %40 = vector.broadcast %25 : vector<8x1xf32> to vector<8x8xf32>
    %41 = arith.mulf %40, %39 : vector<8x8xf32>
    %42 = arith.truncf %28 : vector<8x8xf32> to vector<8x8xbf16>
    %cst_27 = arith.constant dense<0.000000e+00> : vector<8x8xf32>
    %43 = tpu.matmul %42, %15, %cst_27 {dimension_numbers = #tpu.dot_dimension_numbers<[1], [0], [0], [1], [0, 0, 1, 1], [], []>} : vector<8x8xbf16>, vector<8x8xbf16>, vector<8x8xf32> -> vector<8x8xf32>
    %44 = arith.addf %41, %43 : vector<8x8xf32>
    %c0_28 = arith.constant 0 : index
    %c0_29 = arith.constant 0 : index
    %c0_30 = arith.constant 0 : index
    %45 = vector.load %arg10[%c0_28, %c0_29, %c0_30] : memref<4x8x8xf32, #tpu.memory_space<vmem>>, vector<1x8x8xf32>
    %46 = vector.shape_cast %45 : vector<1x8x8xf32> to vector<8x8xf32>
    %47 = vector.shape_cast %44 : vector<8x8xf32> to vector<1x8x8xf32>
    tpu.vector_store %arg10[%c0_28, %c0_29, %c0_30], %47 {strides = array<i32>} : memref<4x8x8xf32, #tpu.memory_space<vmem>>, vector<1x8x8xf32>,
    %c0_31 = arith.constant 0 : index
    %c0_32 = arith.constant 0 : index
    %c0_33 = arith.constant 0 : index
    %48 = vector.load %arg8[%c0_31, %c0_32, %c0_33] : memref<4x8x1xf32, #tpu.memory_space<vmem>>, vector<1x8x1xf32>
    %49 = vector.shape_cast %48 : vector<1x8x1xf32> to vector<8x1xf32>
    %50 = vector.shape_cast %23 : vector<8x1xf32> to vector<1x8x1xf32>
    tpu.vector_store %arg8[%c0_31, %c0_32, %c0_33], %50 {strides = array<i32>} : memref<4x8x1xf32, #tpu.memory_space<vmem>>, vector<1x8x1xf32>,
    %51 = vector.extract_strided_slice %4 {offsets = [0, 8], sizes = [8, 8], strides = [1, 1]} : vector<8x32xbf16> to vector<8x8xbf16>
    %52 = vector.extract_strided_slice %6 {offsets = [0, 8], sizes = [8, 8], strides = [1, 1]} : vector<8x32xbf16> to vector<8x8xbf16>
    %53 = vector.extract_strided_slice %8 {offsets = [0, 8], sizes = [8, 8], strides = [1, 1]} : vector<8x32xbf16> to vector<8x8xbf16>
    %cst_34 = arith.constant dense<0.000000e+00> : vector<8x8xf32>
    %54 = tpu.matmul %51, %52, %cst_34 {dimension_numbers = #tpu.dot_dimension_numbers<[1], [1], [0], [0], [0, 0, 1, 0], [], []>} : vector<8x8xbf16>, vector<8x8xbf16>, vector<8x8xf32> -> vector<8x8xf32>
    %cst_35 = arith.constant -1.000000e+09 : f32
    %55 = vector.broadcast %cst_35 : f32 to vector<8x8xf32>
    %56 = arith.select %12, %54, %55 : vector<8x8xi1>, vector<8x8xf32>
    %c1 = arith.constant 1 : index
    %c0_36 = arith.constant 0 : index
    %c0_37 = arith.constant 0 : index
    %57 = vector.load %arg8[%c1, %c0_36, %c0_37] : memref<4x8x1xf32, #tpu.memory_space<vmem>>, vector<1x8x1xf32>
    %58 = vector.shape_cast %57 : vector<1x8x1xf32> to vector<8x1xf32>
    %cst_38 = arith.constant dense<0xFF800000> : vector<8xf32>
    %59 = vector.multi_reduction <maximumf>, %56, %cst_38 [1] : vector<8x8xf32> to vector<8xf32>
    %60 = vector.shape_cast %59 : vector<8xf32> to vector<8x1xf32>
    %61 = arith.maximumf %58, %60 : vector<8x1xf32>
    %62 = arith.subf %58, %61 : vector<8x1xf32>
    %63 = math.exp %62 : vector<8x1xf32>
    %64 = vector.broadcast %61 : vector<8x1xf32> to vector<8x8xf32>
    %65 = arith.subf %56, %64 : vector<8x8xf32>
    %66 = math.exp %65 : vector<8x8xf32>
    %c1_39 = arith.constant 1 : index
    %c0_40 = arith.constant 0 : index
    %c0_41 = arith.constant 0 : index
    %67 = vector.load %arg9[%c1_39, %c0_40, %c0_41] : memref<4x8x1xf32, #tpu.memory_space<vmem>>, vector<1x8x1xf32>
    %68 = vector.shape_cast %67 : vector<1x8x1xf32> to vector<8x1xf32>
    %69 = arith.mulf %63, %68 : vector<8x1xf32>
    %cst_42 = arith.constant dense<0.000000e+00> : vector<8xf32>
    %70 = vector.multi_reduction <add>, %66, %cst_42 [1] : vector<8x8xf32> to vector<8xf32>
    %71 = vector.shape_cast %70 : vector<8xf32> to vector<8x1xf32>
    %72 = arith.addf %69, %71 : vector<8x1xf32>
    %c1_43 = arith.constant 1 : index
    %c0_44 = arith.constant 0 : index
    %c0_45 = arith.constant 0 : index
    %73 = vector.load %arg9[%c1_43, %c0_44, %c0_45] : memref<4x8x1xf32, #tpu.memory_space<vmem>>, vector<1x8x1xf32>
    %74 = vector.shape_cast %73 : vector<1x8x1xf32> to vector<8x1xf32>
    %75 = vector.shape_cast %72 : vector<8x1xf32> to vector<1x8x1xf32>
    tpu.vector_store %arg9[%c1_43, %c0_44, %c0_45], %75 {strides = array<i32>} : memref<4x8x1xf32, #tpu.memory_space<vmem>>, vector<1x8x1xf32>,
    %c1_46 = arith.constant 1 : index
    %c0_47 = arith.constant 0 : index
    %c0_48 = arith.constant 0 : index
    %76 = vector.load %arg10[%c1_46, %c0_47, %c0_48] : memref<4x8x8xf32, #tpu.memory_space<vmem>>, vector<1x8x8xf32>
    %77 = vector.shape_cast %76 : vector<1x8x8xf32> to vector<8x8xf32>
    %78 = vector.broadcast %63 : vector<8x1xf32> to vector<8x8xf32>
    %79 = arith.mulf %78, %77 : vector<8x8xf32>
    %80 = arith.truncf %66 : vector<8x8xf32> to vector<8x8xbf16>
    %cst_49 = arith.constant dense<0.000000e+00> : vector<8x8xf32>
    %81 = tpu.matmul %80, %53, %cst_49 {dimension_numbers = #tpu.dot_dimension_numbers<[1], [0], [0], [1], [0, 0, 1, 1], [], []>} : vector<8x8xbf16>, vector<8x8xbf16>, vector<8x8xf32> -> vector<8x8xf32>
    %82 = arith.addf %79, %81 : vector<8x8xf32>
    %c1_50 = arith.constant 1 : index
    %c0_51 = arith.constant 0 : index
    %c0_52 = arith.constant 0 : index
    %83 = vector.load %arg10[%c1_50, %c0_51, %c0_52] : memref<4x8x8xf32, #tpu.memory_space<vmem>>, vector<1x8x8xf32>
    %84 = vector.shape_cast %83 : vector<1x8x8xf32> to vector<8x8xf32>
    %85 = vector.shape_cast %82 : vector<8x8xf32> to vector<1x8x8xf32>
    tpu.vector_store %arg10[%c1_50, %c0_51, %c0_52], %85 {strides = array<i32>} : memref<4x8x8xf32, #tpu.memory_space<vmem>>, vector<1x8x8xf32>,
    %c1_53 = arith.constant 1 : index
    %c0_54 = arith.constant 0 : index
    %c0_55 = arith.constant 0 : index
    %86 = vector.load %arg8[%c1_53, %c0_54, %c0_55] : memref<4x8x1xf32, #tpu.memory_space<vmem>>, vector<1x8x1xf32>
    %87 = vector.shape_cast %86 : vector<1x8x1xf32> to vector<8x1xf32>
    %88 = vector.shape_cast %61 : vector<8x1xf32> to vector<1x8x1xf32>
    tpu.vector_store %arg8[%c1_53, %c0_54, %c0_55], %88 {strides = array<i32>} : memref<4x8x1xf32, #tpu.memory_space<vmem>>, vector<1x8x1xf32>,
    %89 = vector.extract_strided_slice %4 {offsets = [0, 16], sizes = [8, 8], strides = [1, 1]} : vector<8x32xbf16> to vector<8x8xbf16>
    %90 = vector.extract_strided_slice %6 {offsets = [0, 16], sizes = [8, 8], strides = [1, 1]} : vector<8x32xbf16> to vector<8x8xbf16>
    %91 = vector.extract_strided_slice %8 {offsets = [0, 16], sizes = [8, 8], strides = [1, 1]} : vector<8x32xbf16> to vector<8x8xbf16>
    %cst_56 = arith.constant dense<0.000000e+00> : vector<8x8xf32>
    %92 = tpu.matmul %89, %90, %cst_56 {dimension_numbers = #tpu.dot_dimension_numbers<[1], [1], [0], [0], [0, 0, 1, 0], [], []>} : vector<8x8xbf16>, vector<8x8xbf16>, vector<8x8xf32> -> vector<8x8xf32>
    %cst_57 = arith.constant -1.000000e+09 : f32
    %93 = vector.broadcast %cst_57 : f32 to vector<8x8xf32>
    %94 = arith.select %12, %92, %93 : vector<8x8xi1>, vector<8x8xf32>
    %c2 = arith.constant 2 : index
    %c0_58 = arith.constant 0 : index
    %c0_59 = arith.constant 0 : index
    %95 = vector.load %arg8[%c2, %c0_58, %c0_59] : memref<4x8x1xf32, #tpu.memory_space<vmem>>, vector<1x8x1xf32>
    %96 = vector.shape_cast %95 : vector<1x8x1xf32> to vector<8x1xf32>
    %cst_60 = arith.constant dense<0xFF800000> : vector<8xf32>
    %97 = vector.multi_reduction <maximumf>, %94, %cst_60 [1] : vector<8x8xf32> to vector<8xf32>
    %98 = vector.shape_cast %97 : vector<8xf32> to vector<8x1xf32>
    %99 = arith.maximumf %96, %98 : vector<8x1xf32>
    %100 = arith.subf %96, %99 : vector<8x1xf32>
    %101 = math.exp %100 : vector<8x1xf32>
    %102 = vector.broadcast %99 : vector<8x1xf32> to vector<8x8xf32>
    %103 = arith.subf %94, %102 : vector<8x8xf32>
    %104 = math.exp %103 : vector<8x8xf32>
    %c2_61 = arith.constant 2 : index
    %c0_62 = arith.constant 0 : index
    %c0_63 = arith.constant 0 : index
    %105 = vector.load %arg9[%c2_61, %c0_62, %c0_63] : memref<4x8x1xf32, #tpu.memory_space<vmem>>, vector<1x8x1xf32>
    %106 = vector.shape_cast %105 : vector<1x8x1xf32> to vector<8x1xf32>
    %107 = arith.mulf %101, %106 : vector<8x1xf32>
    %cst_64 = arith.constant dense<0.000000e+00> : vector<8xf32>
    %108 = vector.multi_reduction <add>, %104, %cst_64 [1] : vector<8x8xf32> to vector<8xf32>
    %109 = vector.shape_cast %108 : vector<8xf32> to vector<8x1xf32>
    %110 = arith.addf %107, %109 : vector<8x1xf32>
    %c2_65 = arith.constant 2 : index
    %c0_66 = arith.constant 0 : index
    %c0_67 = arith.constant 0 : index
    %111 = vector.load %arg9[%c2_65, %c0_66, %c0_67] : memref<4x8x1xf32, #tpu.memory_space<vmem>>, vector<1x8x1xf32>
    %112 = vector.shape_cast %111 : vector<1x8x1xf32> to vector<8x1xf32>
    %113 = vector.shape_cast %110 : vector<8x1xf32> to vector<1x8x1xf32>
    tpu.vector_store %arg9[%c2_65, %c0_66, %c0_67], %113 {strides = array<i32>} : memref<4x8x1xf32, #tpu.memory_space<vmem>>, vector<1x8x1xf32>,
    %c2_68 = arith.constant 2 : index
    %c0_69 = arith.constant 0 : index
    %c0_70 = arith.constant 0 : index
    %114 = vector.load %arg10[%c2_68, %c0_69, %c0_70] : memref<4x8x8xf32, #tpu.memory_space<vmem>>, vector<1x8x8xf32>
    %115 = vector.shape_cast %114 : vector<1x8x8xf32> to vector<8x8xf32>
    %116 = vector.broadcast %101 : vector<8x1xf32> to vector<8x8xf32>
    %117 = arith.mulf %116, %115 : vector<8x8xf32>
    %118 = arith.truncf %104 : vector<8x8xf32> to vector<8x8xbf16>
    %cst_71 = arith.constant dense<0.000000e+00> : vector<8x8xf32>
    %119 = tpu.matmul %118, %91, %cst_71 {dimension_numbers = #tpu.dot_dimension_numbers<[1], [0], [0], [1], [0, 0, 1, 1], [], []>} : vector<8x8xbf16>, vector<8x8xbf16>, vector<8x8xf32> -> vector<8x8xf32>
    %120 = arith.addf %117, %119 : vector<8x8xf32>
    %c2_72 = arith.constant 2 : index
    %c0_73 = arith.constant 0 : index
    %c0_74 = arith.constant 0 : index
    %121 = vector.load %arg10[%c2_72, %c0_73, %c0_74] : memref<4x8x8xf32, #tpu.memory_space<vmem>>, vector<1x8x8xf32>
    %122 = vector.shape_cast %121 : vector<1x8x8xf32> to vector<8x8xf32>
    %123 = vector.shape_cast %120 : vector<8x8xf32> to vector<1x8x8xf32>
    tpu.vector_store %arg10[%c2_72, %c0_73, %c0_74], %123 {strides = array<i32>} : memref<4x8x8xf32, #tpu.memory_space<vmem>>, vector<1x8x8xf32>,
    %c2_75 = arith.constant 2 : index
    %c0_76 = arith.constant 0 : index
    %c0_77 = arith.constant 0 : index
    %124 = vector.load %arg8[%c2_75, %c0_76, %c0_77] : memref<4x8x1xf32, #tpu.memory_space<vmem>>, vector<1x8x1xf32>
    %125 = vector.shape_cast %124 : vector<1x8x1xf32> to vector<8x1xf32>
    %126 = vector.shape_cast %99 : vector<8x1xf32> to vector<1x8x1xf32>
    tpu.vector_store %arg8[%c2_75, %c0_76, %c0_77], %126 {strides = array<i32>} : memref<4x8x1xf32, #tpu.memory_space<vmem>>, vector<1x8x1xf32>,
    %127 = vector.extract_strided_slice %4 {offsets = [0, 24], sizes = [8, 8], strides = [1, 1]} : vector<8x32xbf16> to vector<8x8xbf16>
    %128 = vector.extract_strided_slice %6 {offsets = [0, 24], sizes = [8, 8], strides = [1, 1]} : vector<8x32xbf16> to vector<8x8xbf16>
    %129 = vector.extract_strided_slice %8 {offsets = [0, 24], sizes = [8, 8], strides = [1, 1]} : vector<8x32xbf16> to vector<8x8xbf16>
    %cst_78 = arith.constant dense<0.000000e+00> : vector<8x8xf32>
    %130 = tpu.matmul %127, %128, %cst_78 {dimension_numbers = #tpu.dot_dimension_numbers<[1], [1], [0], [0], [0, 0, 1, 0], [], []>} : vector<8x8xbf16>, vector<8x8xbf16>, vector<8x8xf32> -> vector<8x8xf32>
    %cst_79 = arith.constant -1.000000e+09 : f32
    %131 = vector.broadcast %cst_79 : f32 to vector<8x8xf32>
    %132 = arith.select %12, %130, %131 : vector<8x8xi1>, vector<8x8xf32>
    %c3 = arith.constant 3 : index
    %c0_80 = arith.constant 0 : index
    %c0_81 = arith.constant 0 : index
    %133 = vector.load %arg8[%c3, %c0_80, %c0_81] : memref<4x8x1xf32, #tpu.memory_space<vmem>>, vector<1x8x1xf32>
    %134 = vector.shape_cast %133 : vector<1x8x1xf32> to vector<8x1xf32>
    %cst_82 = arith.constant dense<0xFF800000> : vector<8xf32>
    %135 = vector.multi_reduction <maximumf>, %132, %cst_82 [1] : vector<8x8xf32> to vector<8xf32>
    %136 = vector.shape_cast %135 : vector<8xf32> to vector<8x1xf32>
    %137 = arith.maximumf %134, %136 : vector<8x1xf32>
    %138 = arith.subf %134, %137 : vector<8x1xf32>
    %139 = math.exp %138 : vector<8x1xf32>
    %140 = vector.broadcast %137 : vector<8x1xf32> to vector<8x8xf32>
    %141 = arith.subf %132, %140 : vector<8x8xf32>
    %142 = math.exp %141 : vector<8x8xf32>
    %c3_83 = arith.constant 3 : index
    %c0_84 = arith.constant 0 : index
    %c0_85 = arith.constant 0 : index
    %143 = vector.load %arg9[%c3_83, %c0_84, %c0_85] : memref<4x8x1xf32, #tpu.memory_space<vmem>>, vector<1x8x1xf32>
    %144 = vector.shape_cast %143 : vector<1x8x1xf32> to vector<8x1xf32>
    %145 = arith.mulf %139, %144 : vector<8x1xf32>
    %cst_86 = arith.constant dense<0.000000e+00> : vector<8xf32>
    %146 = vector.multi_reduction <add>, %142, %cst_86 [1] : vector<8x8xf32> to vector<8xf32>
    %147 = vector.shape_cast %146 : vector<8xf32> to vector<8x1xf32>
    %148 = arith.addf %145, %147 : vector<8x1xf32>
    %c3_87 = arith.constant 3 : index
    %c0_88 = arith.constant 0 : index
    %c0_89 = arith.constant 0 : index
    %149 = vector.load %arg9[%c3_87, %c0_88, %c0_89] : memref<4x8x1xf32, #tpu.memory_space<vmem>>, vector<1x8x1xf32>
    %150 = vector.shape_cast %149 : vector<1x8x1xf32> to vector<8x1xf32>
    %151 = vector.shape_cast %148 : vector<8x1xf32> to vector<1x8x1xf32>
    tpu.vector_store %arg9[%c3_87, %c0_88, %c0_89], %151 {strides = array<i32>} : memref<4x8x1xf32, #tpu.memory_space<vmem>>, vector<1x8x1xf32>,
    %c3_90 = arith.constant 3 : index
    %c0_91 = arith.constant 0 : index
    %c0_92 = arith.constant 0 : index
    %152 = vector.load %arg10[%c3_90, %c0_91, %c0_92] : memref<4x8x8xf32, #tpu.memory_space<vmem>>, vector<1x8x8xf32>
    %153 = vector.shape_cast %152 : vector<1x8x8xf32> to vector<8x8xf32>
    %154 = vector.broadcast %139 : vector<8x1xf32> to vector<8x8xf32>
    %155 = arith.mulf %154, %153 : vector<8x8xf32>
    %156 = arith.truncf %142 : vector<8x8xf32> to vector<8x8xbf16>
    %cst_93 = arith.constant dense<0.000000e+00> : vector<8x8xf32>
    %157 = tpu.matmul %156, %129, %cst_93 {dimension_numbers = #tpu.dot_dimension_numbers<[1], [0], [0], [1], [0, 0, 1, 1], [], []>} : vector<8x8xbf16>, vector<8x8xbf16>, vector<8x8xf32> -> vector<8x8xf32>
    %158 = arith.addf %155, %157 : vector<8x8xf32>
    %c3_94 = arith.constant 3 : index
    %c0_95 = arith.constant 0 : index
    %c0_96 = arith.constant 0 : index
    %159 = vector.load %arg10[%c3_94, %c0_95, %c0_96] : memref<4x8x8xf32, #tpu.memory_space<vmem>>, vector<1x8x8xf32>
    %160 = vector.shape_cast %159 : vector<1x8x8xf32> to vector<8x8xf32>
    %161 = vector.shape_cast %158 : vector<8x8xf32> to vector<1x8x8xf32>
    tpu.vector_store %arg10[%c3_94, %c0_95, %c0_96], %161 {strides = array<i32>} : memref<4x8x8xf32, #tpu.memory_space<vmem>>, vector<1x8x8xf32>,
    %c3_97 = arith.constant 3 : index
    %c0_98 = arith.constant 0 : index
    %c0_99 = arith.constant 0 : index
    %162 = vector.load %arg8[%c3_97, %c0_98, %c0_99] : memref<4x8x1xf32, #tpu.memory_space<vmem>>, vector<1x8x1xf32>
    %163 = vector.shape_cast %162 : vector<1x8x1xf32> to vector<8x1xf32>
    %164 = vector.shape_cast %137 : vector<8x1xf32> to vector<1x8x1xf32>
    tpu.vector_store %arg8[%c3_97, %c0_98, %c0_99], %164 {strides = array<i32>} : memref<4x8x1xf32, #tpu.memory_space<vmem>>, vector<1x8x1xf32>,
    %c0_i32_100 = arith.constant 0 : i32
    %165 = arith.cmpi eq, %arg2, %c0_i32_100 : i32
    %166 = arith.extui %165 : i1 to i32
    %c0_i32_101 = arith.constant 0 : i32
    %167 = arith.cmpi ne, %166, %c0_i32_101 : i32
    scf.if %167 {
      %c0_102 = arith.constant 0 : index
      %c0_103 = arith.constant 0 : index
      %c0_104 = arith.constant 0 : index
      %168 = vector.load %arg9[%c0_102, %c0_103, %c0_104] : memref<4x8x1xf32, #tpu.memory_space<vmem>>, vector<1x8x1xf32>
      %169 = vector.shape_cast %168 : vector<1x8x1xf32> to vector<8x1xf32>
      %170 = tpu.reciprocal %169 {approx = true} : vector<8x1xf32> -> vector<8x1xf32>
      %c0_105 = arith.constant 0 : index
      %c0_106 = arith.constant 0 : index
      %c0_107 = arith.constant 0 : index
      %171 = vector.load %arg10[%c0_105, %c0_106, %c0_107] : memref<4x8x8xf32, #tpu.memory_space<vmem>>, vector<1x8x8xf32>
      %172 = vector.shape_cast %171 : vector<1x8x8xf32> to vector<8x8xf32>
      %173 = vector.broadcast %170 : vector<8x1xf32> to vector<8x8xf32>
      %174 = arith.mulf %172, %173 : vector<8x8xf32>
      %c1_108 = arith.constant 1 : index
      %c0_109 = arith.constant 0 : index
      %c0_110 = arith.constant 0 : index
      %175 = vector.load %arg9[%c1_108, %c0_109, %c0_110] : memref<4x8x1xf32, #tpu.memory_space<vmem>>, vector<1x8x1xf32>
      %176 = vector.shape_cast %175 : vector<1x8x1xf32> to vector<8x1xf32>
      %177 = tpu.reciprocal %176 {approx = true} : vector<8x1xf32> -> vector<8x1xf32>
      %c1_111 = arith.constant 1 : index
      %c0_112 = arith.constant 0 : index
      %c0_113 = arith.constant 0 : index
      %178 = vector.load %arg10[%c1_111, %c0_112, %c0_113] : memref<4x8x8xf32, #tpu.memory_space<vmem>>, vector<1x8x8xf32>
      %179 = vector.shape_cast %178 : vector<1x8x8xf32> to vector<8x8xf32>
      %180 = vector.broadcast %177 : vector<8x1xf32> to vector<8x8xf32>
      %181 = arith.mulf %179, %180 : vector<8x8xf32>
      %c2_114 = arith.constant 2 : index
      %c0_115 = arith.constant 0 : index
      %c0_116 = arith.constant 0 : index
      %182 = vector.load %arg9[%c2_114, %c0_115, %c0_116] : memref<4x8x1xf32, #tpu.memory_space<vmem>>, vector<1x8x1xf32>
      %183 = vector.shape_cast %182 : vector<1x8x1xf32> to vector<8x1xf32>
      %184 = tpu.reciprocal %183 {approx = true} : vector<8x1xf32> -> vector<8x1xf32>
      %c2_117 = arith.constant 2 : index
      %c0_118 = arith.constant 0 : index
      %c0_119 = arith.constant 0 : index
      %185 = vector.load %arg10[%c2_117, %c0_118, %c0_119] : memref<4x8x8xf32, #tpu.memory_space<vmem>>, vector<1x8x8xf32>
      %186 = vector.shape_cast %185 : vector<1x8x8xf32> to vector<8x8xf32>
      %187 = vector.broadcast %184 : vector<8x1xf32> to vector<8x8xf32>
      %188 = arith.mulf %186, %187 : vector<8x8xf32>
      %c3_120 = arith.constant 3 : index
      %c0_121 = arith.constant 0 : index
      %c0_122 = arith.constant 0 : index
      %189 = vector.load %arg9[%c3_120, %c0_121, %c0_122] : memref<4x8x1xf32, #tpu.memory_space<vmem>>, vector<1x8x1xf32>
      %190 = vector.shape_cast %189 : vector<1x8x1xf32> to vector<8x1xf32>
      %191 = tpu.reciprocal %190 {approx = true} : vector<8x1xf32> -> vector<8x1xf32>
      %c3_123 = arith.constant 3 : index
      %c0_124 = arith.constant 0 : index
      %c0_125 = arith.constant 0 : index
      %192 = vector.load %arg10[%c3_123, %c0_124, %c0_125] : memref<4x8x8xf32, #tpu.memory_space<vmem>>, vector<1x8x8xf32>
      %193 = vector.shape_cast %192 : vector<1x8x8xf32> to vector<8x8xf32>
      %194 = vector.broadcast %191 : vector<8x1xf32> to vector<8x8xf32>
      %195 = arith.mulf %193, %194 : vector<8x8xf32>
      %196 = tpu.concatenate %174, %181, %188, %195 in 1 : vector<8x8xf32>, vector<8x8xf32>, vector<8x8xf32>, vector<8x8xf32> -> vector<8x32xf32>
      %197 = arith.truncf %196 : vector<8x32xf32> to vector<8x32xbf16>
      %c0_126 = arith.constant 0 : index
      %c0_127 = arith.constant 0 : index
      %c0_128 = arith.constant 0 : index
      %198 = vector.load %arg7[%c0_126, %c0_127, %c0_128] : memref<1x8x32xbf16, #tpu.memory_space<vmem>>, vector<1x8x32xbf16>
      %199 = vector.shape_cast %198 : vector<1x8x32xbf16> to vector<8x32xbf16>
      %200 = vector.shape_cast %197 : vector<8x32xbf16> to vector<1x8x32xbf16>
      tpu.vector_store %arg7[%c0_126, %c0_127, %c0_128], %200 {strides = array<i32>} : memref<1x8x32xbf16, #tpu.memory_space<vmem>>, vector<1x8x32xbf16>,
    } else {
    }
    return
  }
  func.func @transform_0(%arg0: i32, %arg1: i32, %arg2: i32) -> (i32, i32, i32) {
    %c0_i32 = arith.constant 0 : i32
    %c0_i32_0 = arith.constant 0 : i32
    return %arg0, %arg1, %c0_i32 : i32, i32, i32
  }
  func.func @transform_1(%arg0: i32, %arg1: i32, %arg2: i32) -> (i32, i32, i32) {
    %c0_i32 = arith.constant 0 : i32
    %c0_i32_0 = arith.constant 0 : i32
    return %arg0, %arg2, %c0_i32 : i32, i32, i32
  }
  func.func @transform_2(%arg0: i32, %arg1: i32, %arg2: i32) -> (i32, i32, i32) {
    %c0_i32 = arith.constant 0 : i32
    %c0_i32_0 = arith.constant 0 : i32
    return %arg0, %arg2, %c0_i32 : i32, i32, i32
  }
  func.func @transform_3(%arg0: i32, %arg1: i32, %arg2: i32) -> (i32, i32, i32) {
    %c0_i32 = arith.constant 0 : i32
    return %arg0, %arg1, %arg2 : i32, i32, i32
  }
  func.func @transform_4(%arg0: i32, %arg1: i32, %arg2: i32) -> (i32, i32, i32) {
    %c0_i32 = arith.constant 0 : i32
    %c0_i32_0 = arith.constant 0 : i32
    return %arg0, %arg1, %c0_i32 : i32, i32, i32
  }
}

module attributes {stable_mosaic.version = 11 : i64} {
  func.func @_linear_kernel(%arg0: i32, %arg1: i32, %arg2: i32, %arg3: memref<16x32xbf16, #tpu.memory_space<vmem>>, %arg4: memref<32x32xbf16, #tpu.memory_space<vmem>>, %arg5: memref<1x32xf32, #tpu.memory_space<vmem>>, %arg6: memref<16x32xf32, #tpu.memory_space<vmem>>, %arg7: memref<16x32xf32, #tpu.memory_space<vmem>>) attributes {dimension_semantics = [#tpu.dimension_semantics<parallel>, #tpu.dimension_semantics<parallel>, #tpu.dimension_semantics<arbitrary>], iteration_bounds = array<i64: 1, 1, 1>, scalar_prefetch = 0 : i64, scratch_operands = 1 : i64, tpu.core_type = #tpu.core_type<tc>, window_params = [{transform_indices = @transform_0, window_bounds = array<i64: 16, 32>}, {transform_indices = @transform_1, window_bounds = array<i64: 32, 32>}, {transform_indices = @transform_2, window_bounds = array<i64: 1, 32>}, {transform_indices = @transform_3, window_bounds = array<i64: 16, 32>}]} {
    %c0_i32 = arith.constant 0 : i32
    %0 = arith.cmpi eq, %arg2, %c0_i32 : i32
    %1 = arith.extui %0 : i1 to i32
    %c0_i32_0 = arith.constant 0 : i32
    %2 = arith.cmpi ne, %1, %c0_i32_0 : i32
    scf.if %2 {
      %cst_10 = arith.constant 0.000000e+00 : f32
      %12 = vector.broadcast %cst_10 : f32 to vector<16x32xf32>
      %c0_11 = arith.constant 0 : index
      %c0_12 = arith.constant 0 : index
      %13 = vector.load %arg7[%c0_11, %c0_12] : memref<16x32xf32, #tpu.memory_space<vmem>>, vector<16x32xf32>
      tpu.vector_store %arg7[%c0_11, %c0_12], %12 {strides = array<i32>} : memref<16x32xf32, #tpu.memory_space<vmem>>, vector<16x32xf32>,
    } else {
    }
    %c0 = arith.constant 0 : index
    %c0_1 = arith.constant 0 : index
    %3 = vector.load %arg7[%c0, %c0_1] : memref<16x32xf32, #tpu.memory_space<vmem>>, vector<16x32xf32>
    %c0_2 = arith.constant 0 : index
    %c0_3 = arith.constant 0 : index
    %4 = vector.load %arg3[%c0_2, %c0_3] : memref<16x32xbf16, #tpu.memory_space<vmem>>, vector<16x32xbf16>
    %c0_4 = arith.constant 0 : index
    %c0_5 = arith.constant 0 : index
    %5 = vector.load %arg4[%c0_4, %c0_5] : memref<32x32xbf16, #tpu.memory_space<vmem>>, vector<32x32xbf16>
    %cst = arith.constant dense<0.000000e+00> : vector<16x32xf32>
    %6 = tpu.matmul %4, %5, %cst {dimension_numbers = #tpu.dot_dimension_numbers<[1], [0], [0], [1], [0, 0, 1, 1], [], []>} : vector<16x32xbf16>, vector<32x32xbf16>, vector<16x32xf32> -> vector<16x32xf32>
    %7 = arith.addf %3, %6 : vector<16x32xf32>
    %c0_6 = arith.constant 0 : index
    %c0_7 = arith.constant 0 : index
    %8 = vector.load %arg7[%c0_6, %c0_7] : memref<16x32xf32, #tpu.memory_space<vmem>>, vector<16x32xf32>
    tpu.vector_store %arg7[%c0_6, %c0_7], %7 {strides = array<i32>} : memref<16x32xf32, #tpu.memory_space<vmem>>, vector<16x32xf32>,
    %c0_i32_8 = arith.constant 0 : i32
    %9 = arith.cmpi eq, %arg2, %c0_i32_8 : i32
    %10 = arith.extui %9 : i1 to i32
    %c0_i32_9 = arith.constant 0 : i32
    %11 = arith.cmpi ne, %10, %c0_i32_9 : i32
    scf.if %11 {
      %c0_10 = arith.constant 0 : index
      %c0_11 = arith.constant 0 : index
      %12 = vector.load %arg7[%c0_10, %c0_11] : memref<16x32xf32, #tpu.memory_space<vmem>>, vector<16x32xf32>
      %c0_12 = arith.constant 0 : index
      %c0_13 = arith.constant 0 : index
      %13 = vector.load %arg5[%c0_12, %c0_13] : memref<1x32xf32, #tpu.memory_space<vmem>>, vector<1x32xf32>
      %14 = vector.broadcast %13 : vector<1x32xf32> to vector<16x32xf32>
      %15 = arith.addf %12, %14 : vector<16x32xf32>
      %c0_14 = arith.constant 0 : index
      %c0_15 = arith.constant 0 : index
      %16 = vector.load %arg6[%c0_14, %c0_15] : memref<16x32xf32, #tpu.memory_space<vmem>>, vector<16x32xf32>
      tpu.vector_store %arg6[%c0_14, %c0_15], %15 {strides = array<i32>} : memref<16x32xf32, #tpu.memory_space<vmem>>, vector<16x32xf32>,
    } else {
    }
    return
  }
  func.func @transform_0(%arg0: i32, %arg1: i32, %arg2: i32) -> (i32, i32) {
    %c0_i32 = arith.constant 0 : i32
    return %arg0, %arg2 : i32, i32
  }
  func.func @transform_1(%arg0: i32, %arg1: i32, %arg2: i32) -> (i32, i32) {
    %c0_i32 = arith.constant 0 : i32
    return %arg2, %arg1 : i32, i32
  }
  func.func @transform_2(%arg0: i32, %arg1: i32, %arg2: i32) -> (i32, i32) {
    %c0_i32 = arith.constant 0 : i32
    %c0_i32_0 = arith.constant 0 : i32
    return %c0_i32, %arg1 : i32, i32
  }
  func.func @transform_3(%arg0: i32, %arg1: i32, %arg2: i32) -> (i32, i32) {
    %c0_i32 = arith.constant 0 : i32
    return %arg0, %arg1 : i32, i32
  }
}

</mosaic_0001>

<bundles_post_ra>
// kernel: multi_head_attention.5
= control target key start
LH: loop header
LB: loop body
LE: loop exit
PB: predicated region body
PF: predicated region fallthrough
CT: control target
= control target key end

     0   :  { %vm19_vm0 = vcmask 261120   ;;  %v107_v1 = vmov 0.0   ;;  %vm82_vm1 = vcmask 257024   ;;  %s151_s1 = inlined_call_operand.vmem [shape: bf16[32,32], index: 1, kind: input, shape index: {}]   ;;  %s152_s2 = inlined_call_operand.vmem [shape: f32[1,32], index: 2, kind: input, shape index: {}]   ;;  %s153_s0 = inlined_call_operand.vmem [shape: bf16[16,32], index: 0, kind: input, shape index: {}]   ;;  %s154_s3 = inlined_call_operand.vmem [shape: bf16[16,32], index: 3, kind: output, shape index: {}]  }
   0x1   :  { %v104_v0 = vld [vmem:[%s151_s1 + $0x8] sm:$0xff]  ;;  %20 = vst.msk [vmem:[#allocation2] sm:$0xff] %vm19_vm0, %v107_v1  ;;  %v103_v2 = vld [vmem:[%s151_s1] sm:$0xff] }
   0x2   :  { %21 = vst.msk [vmem:[#allocation2 + $0x8] sm:$0xff] %vm19_vm0, %v107_v1  ;;  %57 = vmatpush.bf16.msra.mxu0 %v104_v0  ;;  %v102_v3 = vld [vmem:[%s153_s0] sm:$0xff] }
   0x3   :  { %v106_v8 = vld [vmem:[%s152_s2] ss:$0 sm:$0xff] }
   0x6   :  { %58 = vmatpush.bf16.msra.mxu0 %v103_v2 }
   0x8   :  { %v22_v4 = vld [vmem:[#allocation2] sm:$0xff] }
   0x9   :  { %101 = vmatmul.msk.bf16.vlgmr.msra.gmra.mxu0 %vm19_vm0, %v102_v3  ;;  %v23_v7 = vld [vmem:[#allocation2 + $0x8] sm:$0xff] }
  0x86   :  { %v60_v5 = vpop.f32.mrf.mxu0 }
  0x87   :  { %v65_v6 = vadd.f32 %v60_v5, %v22_v4 }
  0x89   :  { %67 = vst.msk [vmem:[#allocation2] sm:$0xff] %vm19_vm0, %v65_v6 }
  0x8e   :  { %v62_v9 = vpop.f32.mrf.mxu0 }
  0x8f   :  { %v66_v10 = vadd.f32 %v62_v9, %v23_v7 }
  0x90   :  { %v72_v11 = vld [vmem:[#allocation2] sm:$0xff] }
  0x91   :  { %v78_v12 = vadd.f32 %v106_v8, %v72_v11  ;;  %68 = vst.msk [vmem:[#allocation2 + $0x8] sm:$0xff] %vm19_vm0, %v66_v10 }
  0x93   :  { %v80_v13 = vpack.c.bf16 %v78_v12, %v78_v12 }
  0x95   :  { %83 = vst.msk [vmem:[%s154_s3] sm:$0xf] %vm82_vm1, %v80_v13 }
  0x98   :  { %v73_v14 = vld [vmem:[#allocation2 + $0x8] sm:$0xff] }
  0x99   :  { %v79_v15 = vadd.f32 %v106_v8, %v73_v14 }
  0x9b   :  { %v81_v16 = vpack.c.bf16 %v79_v15, %v79_v15 }
  0x9d   :  { %84 = vst.msk [vmem:[%s154_s3 + $0x4] sm:$0xf] %vm82_vm1, %v81_v16 }

// kernel: multi_head_attention.9
= control target key start
LH: loop header
LB: loop body
LE: loop exit
PB: predicated region body
PF: predicated region fallthrough
CT: control target
= control target key end

     0   :  { %vm20_vm0 = vcmask 261120   ;;  %v148_v1 = vmov 0.0   ;;  %s194_s0 = inlined_call_operand.vmem [shape: bf16[16,32], index: 0, kind: input, shape index: {}]   ;;  %s195_s1 = inlined_call_operand.vmem [shape: bf16[32,32], index: 1, kind: input, shape index: {}]   ;;  %s196_s2 = inlined_call_operand.vmem [shape: f32[1,32], index: 2, kind: input, shape index: {}]   ;;  %s197_s3 = inlined_call_operand.hbm [shape: f32[16,32], index: 3, kind: output, shape index: {}]  }
   0x1   :  { %v116_v0 = vld [vmem:[%s195_s1 + $0x8] sm:$0xff]  ;;  %21 = vst.msk [vmem:[#allocation2] sm:$0xff] %vm20_vm0, %v148_v1 }
   0x2   :  { %8 = vsyncpa [#allocation4], 0  ;;  %58 = vmatpush.bf16.msra.mxu0 %v116_v0  ;;  %v115_v2 = vld [vmem:[%s195_s1] sm:$0xff]  ;;  %22 = vst.msk [vmem:[#allocation2 + $0x8] sm:$0xff] %vm20_vm0, %v148_v1  ;;  %s89_s22 = sshll.u32 %s197_s3, 4  ;;  %s151_s23 = smov 8   ;;  %s90_s22 = int_to_ptr.hbm [resolvable:$true] %s89_s22 }
   0x3   :  { %v114_v3 = vld [vmem:[%s194_s0] sm:$0xff]  ;;  %s149_s0 = smov [#allocation3]  }
   0x4   :  { %v121_v8 = vld [vmem:[%s196_s2] ss:$0 sm:$0xff]  ;;  %s87_s1 = sshll.u32 %s149_s0, 4  ;;  %s150_s2 = smov 128   ;;  %s88_s1 = int_to_ptr.vmem [resolvable:$true] %s87_s1 }
   0x6   :  { %59 = vmatpush.bf16.msra.mxu0 %v115_v2 }
   0x8   :  { %v23_v4 = vld [vmem:[#allocation2] sm:$0xff] }
   0x9   :  { %113 = vmatmul.msk.bf16.vlgmr.msra.gmra.mxu0 %vm20_vm0, %v114_v3  ;;  %v24_v7 = vld [vmem:[#allocation2 + $0x8] sm:$0xff] }
  0x86   :  { %v61_v5 = vpop.f32.mrf.mxu0 }
  0x87   :  { %v66_v6 = vadd.f32 %v61_v5, %v23_v4 }
  0x89   :  { %68 = vst.msk [vmem:[#allocation2] sm:$0xff] %vm20_vm0, %v66_v6 }
  0x8e   :  { %v63_v9 = vpop.f32.mrf.mxu0 }
  0x8f   :  { %v67_v10 = vadd.f32 %v63_v9, %v24_v7 }
  0x90   :  { %v73_v11 = vld [vmem:[#allocation2] sm:$0xff] }
  0x91   :  { %69 = vst.msk [vmem:[#allocation2 + $0x8] sm:$0xff] %vm20_vm0, %v67_v10  ;;  %v79_v12 = vadd.f32 %v121_v8, %v73_v11 }
  0x93   :  { %81 = vst.msk [vmem:[#allocation3] sm:$0xff] %vm20_vm0, %v79_v12 }
  0x98   :  { %v74_v13 = vld [vmem:[#allocation2 + $0x8] sm:$0xff] }
  0x99   :  { %v80_v14 = vadd.f32 %v121_v8, %v74_v13 }
  0x9b   :  { %82 = vst.msk [vmem:[#allocation3 + $0x8] sm:$0xff] %vm20_vm0, %v80_v14 }
  0x9c   :  { %95 = dma.vmem_to_hbm [thread:$0]  %s88_s1, 256, %s90_s22, [#allocation4], %s150_s2, %s150_s2, %s151_s23  }
  0x9d   :  { %146 = dma.done.wait [#allocation4], 256  }
  0x9e   :  { %147 = vsyncadd [#allocation4], 4294967040 }
  0x9f   :  { %100 = vsyncpa [#allocation4], 1 }

// kernel: multi_head_attention.8
= control target key start
LH: loop header
LB: loop body
LE: loop exit
PB: predicated region body
PF: predicated region fallthrough
CT: control target
= control target key end

     0   :  { %s1008_s15 = smov 0   ;;  %s1010_s16 = smov 0   ;;  %s1149_s0 = inlined_call_operand.vmem [shape: bf16[2,8,32], index: 0, kind: input, shape index: {}]   ;;  %s1150_s1 = inlined_call_operand.vmem [shape: bf16[2,8,32], index: 1, kind: input, shape index: {}]   ;;  %s1151_s2 = inlined_call_operand.vmem [shape: bf16[2,8,32], index: 2, kind: input, shape index: {}]   ;;  %s1152_s3 = inlined_call_operand.vmem [shape: s8[2,8,8], index: 3, kind: input, shape index: {}]   ;;  %s1153_s4 = inlined_call_operand.vmem [shape: bf16[2,8,32], index: 4, kind: output, shape index: {}]  }
   0x1   :  { %s1012_s17 = smov 0  }
   0x2 LB: > { %s33_s18 = sadd.s32 1, %s968_s16  ;;  %p874_p0 = scmp.ge.s32.totalorder %s972_s17, 1  ;;  %s972_s17 = sphi %s1012_s17, %s14_s17   ;;  %s968_s16 = sphi %s1010_s16, %s1157_s16   ;;  %s964_s15 = sphi %s1008_s15, %s1156_s15  }
   0x3   : > { %p35_p1 = scmp.ge.s32.totalorder %s33_s18, 2  ;;  %p234_p2 = scmp.lt.s32.totalorder %s972_s17, 3 }
   0x5   : > { %s1159_s18 = smov (%p35_p1, %s33_s18), 0  ;;  %p235_p3 = pnand %p874_p0, %p234_p2 }
   0x6   : > { %p288_p4 = scmp.lt.s32.totalorder (!%p235_p3), %s964_s15, 1  ;;  %s976_s30 = smov (!%p235_p3), 112  }
   0x7   : > { %238 = sbr.rel (%p235_p3) target bundleno = 1133 (0x46d), region = 36  ;;  %s977_s5 = smov (!%p235_p3), 104  }
   0x8   : > { %s978_s6 = smov (!%p235_p3), 120   ;;  %s980_s10 = smov (!%p235_p3), 8  }
   0x9   : > { %s981_s11 = smov (!%p235_p3), 24   ;;  %s982_s12 = smov (!%p235_p3), 16  }
   0xc   : > { %s1161_s15 = smov (!%p288_p4, %s964_s15), 1  ;;  %vm342_vm0 = vcmask 64512   ;;  %v974_v3 = vmov 0   ;;  %vm333_vm1 = vcmask 7168   ;;  %v975_v4 = vmov -inf  }
   0xd   : > { %s1026_s19 = sshll.u32 %s1161_s15, 2  ;;  %923 = vset.pattern.permute.xlu1 %v974_v3  ;;  %924 = vset.pattern.permute.xlu2 %v974_v3  ;;  %334 = vst.msk [vmem:[#allocation2] sm:$0xff] %vm333_vm1, %v975_v4  ;;  %s878_s26 = sshll.u32 %s1161_s15, 1  ;;  %v979_v17 = vmov 0.0   ;;  %vm411_vm4 = vcmask 1043456   ;;  %vm738_vm5 = vcmask 130048  }
   0xe   : > { %s301_s22 = scalar_lea.vmem %s1150_s1, %s1026_s19  ;;  %s294_s25 = scalar_lea.vmem %s1149_s0, %s1026_s19  ;;  %925 = vset.pattern.permute.xlu0 %v974_v3  ;;  %335 = vst.msk [vmem:[#allocation2 + $0x8] sm:$0xff] %vm333_vm1, %v975_v4  ;;  %vm740_vm6 = vcmask 195584   ;;  %vm743_vm7 = vcmask 257024  }
   0xf   : > { %v348_v0 = vld [vmem:[%s301_s22] sm:$0xf]  ;;  %336 = vst.msk [vmem:[#allocation2 + $0x10] sm:$0xff] %vm333_vm1, %v975_v4  ;;  %s318_s29 = scalar_lea.vmem %s1152_s3, %s878_s26  ;;  %s308_s9 = scalar_lea.vmem %s1151_s2, %s1026_s19 }
  0x10   : > { %v357_v1 = vsel %vm342_vm0, %v348_v0, 0  ;;  %v347_v2 = vld [vmem:[%s294_s25] sm:$0xf]  ;;  %337 = vst.msk [vmem:[#allocation2 + $0x18] sm:$0xff] %vm333_vm1, %v975_v4  ;;  %v437_v8 = vunpack.c.l.b16 %v348_v0  ;;  %s325_s15 = scalar_lea.vmem %s1153_s4, %s1026_s19 }
  0x11   : > { %366 = vmatpush.bf16.xpose.msra.mxu0 %v357_v1  ;;  %v350_v5 = vld [vmem:[%s318_s29] sm:$0x3]  ;;  %v432_v15 = vunpack.c.l.b16 %v347_v2  ;;  %338 = vst.msk [vmem:[#allocation3] sm:$0xff] %vm333_vm1, %v979_v17 }
  0x12   : > { %vm351_vm2 = vnez %v350_v5  ;;  %v438_v10 = vpack.c.b16 %v437_v8, %v437_v8  ;;  %339 = vst.msk [vmem:[#allocation3 + $0x8] sm:$0xff] %vm333_vm1, %v979_v17  ;;  %v349_v25 = vld [vmem:[%s308_s9] sm:$0xf] }
  0x13   : > { %v372_v6 = vsel %vm351_vm2, 16843009, %v974_v3  ;;  %v433_v16 = vpack.c.b16 %v432_v15, %v432_v15  ;;  %340 = vst.msk [vmem:[#allocation3 + $0x10] sm:$0xff] %vm333_vm1, %v979_v17  ;;  %v413_v26 = vsel %vm411_vm4, %v349_v25, 0  ;;  %v496_v51 = vunpack.c.l.b16 %v349_v25 }
  0x14   : > { %v373_v7 = vunpack.c.0.s8 %v372_v6  ;;  %524 = vrot.lane.b32.xlu2 %v438_v10, %s976_s30  ;;  %341 = vst.msk [vmem:[#allocation3 + $0x18] sm:$0xff] %vm333_vm1, %v979_v17  ;;  %v1064_v18 = vld [vmem:[#allocation2] sm:$0xff]  ;;  %422 = vmatpush.bf16.msra.mxu1 %v413_v26 }
  0x15   : > { %343 = vst.msk [vmem:[#allocation4] sm:$0xff] %vm342_vm0, %v979_v17  ;;  %v497_v53 = vpack.c.b16 %v496_v51, %v496_v51  ;;  %v462_v59 = vld [vmem:[#allocation2 + $0x8] sm:$0xff] }
  0x16   : > { %vm1045_vm3 = vcmp.ne.s32.totalorder %v373_v7, 0  ;;  %344 = vst.msk [vmem:[#allocation4 + $0x8] sm:$0xff] %vm342_vm0, %v979_v17  ;;  %v547_v62 = vld [vmem:[#allocation2 + $0x10] sm:$0xff] }
  0x17   : > { %345 = vst.msk [vmem:[#allocation4 + $0x10] sm:$0xff] %vm342_vm0, %v979_v17  ;;  %v629_v55 = vld [vmem:[#allocation2 + $0x18] sm:$0xff] }
  0x18   : > { %880 = vmatmul.msk.bf16.vlgmr.msra.gmra.mxu0 %vm342_vm0, %v347_v2  ;;  %346 = vst.msk [vmem:[#allocation4 + $0x18] sm:$0xff] %vm342_vm0, %v979_v17  ;;  %v392_v9 = vld [vmem:[#allocation3] sm:$0xff] }
  0x1c   : > { %606 = vrot.lane.b32.xlu2 %v438_v10, %s977_s5 }
  0x24   : > { %604 = vrot.lane.b32.xlu2 %v433_v16, %s977_s5 }
  0x6e   : > { %v525_v24 = vpop.permute.xlu2 %524 }
  0x6f   : > { %v530_v27 = vsel %vm342_vm0, %v525_v24, 0 }
  0x70   : > { %539 = vmatpush.bf16.xpose.msrb.mxu1 %v530_v27 }
  0x76   : > { %v607_v28 = vpop.permute.xlu2 %606 }
  0x77   : > { %v612_v29 = vsel %vm342_vm0, %v607_v28, 0 }
  0x78   : > { %621 = vmatpush.bf16.xpose.msrb.mxu0 %v612_v29 }
  0x7e   : > { %v605_v30 = vpop.permute.xlu2 %604 }
  0x7f   : > { %886 = vmatmul.msk.bf16.vlgmr.msrb.gmra.mxu0 %vm342_vm0, %v605_v30  ;;  %v400_v30 = vld [vmem:[#allocation4] sm:$0xff] }
  0x95   : > { %v368_v11 = vpop.f32.mrf.mxu0 }
  0x96   : > { %v375_v12 = vsel %vm1045_vm3, %v368_v11, -1e+09 }
  0x97   : > { %v377_v13 = vsel %vm342_vm0, %v375_v12, -inf }
  0x98   : > { %378 = vmax.xlane.f32.xlu0 %v377_v13 }
  0x9d   : > { %v370_v14 = vpop.f32.mrf.mxu0 }
  0xac   : > { %439 = vrot.lane.b32.xlu0 %v438_v10, %s978_s6 }
  0xfc   : > { %v623_v38 = vpop.f32.mrf.mxu0 }
  0xfd   : > { %v1090_v39 = vsel %vm1045_vm3, %v623_v38, -1e+09 }
  0xfe   : > { %v630_v40 = vsel %vm342_vm0, %v1090_v39, -inf }
  0xff   : > { %631 = vmax.xlane.f32.xlu0 %v630_v40 }
 0x104   : > { %v625_v41 = vpop.f32.mrf.mxu0 }
 0x10b   : > { %v379_v19 = vpop.xlane.xlu0 %378 }
 0x10c   : > { %v1067_v20 = vmax.f32 %v1064_v18, %v379_v19 }
 0x10e   : > { %v381_v21 = vsub.f32 %v1064_v18, %v1067_v20  ;;  %430 = vst.msk [vmem:[#allocation2] sm:$0xff] %vm333_vm1, %v1067_v20  ;;  %386 = vperm.xlu1 %923, %v1067_v20  }
 0x110   : > { %v382_v0 = vmul.f32 1.442695, %v381_v21 }
 0x116   : > { %434 = vrot.lane.b32.xlu1 %v433_v16, %s978_s6 }
 0x11e   : > { %522 = vrot.lane.b32.xlu1 %v433_v16, %s976_s30  ;;  %v440_v22 = vpop.permute.xlu0 %439 }
 0x11f   : > { %v445_v23 = vsel %vm342_vm0, %v440_v22, 0 }
 0x120   : > { %454 = vmatpush.bf16.xpose.msra.mxu2 %v445_v23 }
 0x172   : > { %v632_v56 = vpop.xlane.xlu0 %631 }
 0x173   : > { %v633_v57 = vmax.f32 %v629_v55, %v632_v56 }
 0x175   : > { %v634_v58 = vsub.f32 %v629_v55, %v633_v57  ;;  %685 = vst.msk [vmem:[#allocation2 + $0x18] sm:$0xff] %vm333_vm1, %v633_v57 }
 0x177   : > { %v635_v29 = vmul.f32 1.442695, %v634_v58 }
 0x180   : > { %v387_v31 = vpop.permute.xlu1 %386 }
 0x181   : > { %v389_v32 = vsub.f32 %v375_v12, %v387_v31 }
 0x183   : > { %v390_v33 = vmul.f32 1.442695, %v389_v32 }
 0x185   : > { %926 = vpow2.f32 %v390_v33 }
 0x186   : > { %928 = vpow2.f32 %v382_v0 }
 0x188   : > { %v435_v34 = vpop.permute.xlu1 %434 }
 0x189   : > { %882 = vmatmul.msk.bf16.vlgmr.msra.gmra.mxu2 %vm342_vm0, %v435_v34 }
 0x18b   : > { %v927_v35 = vpop.eup %926 }
 0x18c   : > { %v407_v36 = vpack.c.bf16 %v927_v35, %v927_v35  ;;  %v394_v54 = vsel %vm342_vm0, %v927_v35, 0.0  ;;  %v929_v5 = vpop.eup %928 }
 0x18d   : > { %v393_v11 = vmul.f32 %v929_v5, %v392_v9 }
 0x18e   : > { %881 = vmatmul.msk.bf16.vlgmr.msra.gmra.mxu1 %vm342_vm0, %v407_v36 }
 0x190   : > { %v523_v37 = vpop.permute.xlu1 %522 }
 0x19e   : > { %884 = vmatmul.msk.bf16.vlgmr.msrb.gmra.mxu1 %vm342_vm0, %v523_v37 }
 0x20b   : > { %v1094_v42 = vpop.f32.mrf.mxu1 }
 0x20c   : > { %v456_v43 = vpop.f32.mrf.mxu2 }
 0x20d   : > { %v460_v44 = vsel %vm1045_vm3, %v456_v43, -1e+09 }
 0x20e   : > { %v463_v45 = vsel %vm342_vm0, %v460_v44, -inf }
 0x20f   : > { %464 = vmax.xlane.f32.xlu1 %v463_v45  ;;  %v479_v45 = vld [vmem:[#allocation3 + $0x8] sm:$0xff] }
 0x213   : > { %v426_v46 = vpop.f32.mrf.mxu1 }
 0x214   : > { %v458_v47 = vpop.f32.mrf.mxu2 }
 0x21b   : > { %v541_v48 = vpop.f32.mrf.mxu1 }
 0x21c   : > { %v1101_v49 = vsel %vm1045_vm3, %v541_v48, -1e+09 }
 0x21d   : > { %v548_v50 = vsel %vm342_vm0, %v1101_v49, -inf }
 0x21e   : > { %549 = vmax.xlane.f32.xlu2 %v548_v50 }
 0x223   : > { %v543_v52 = vpop.f32.mrf.mxu1 }
 0x228   : > { %498 = vrot.lane.b32.xlu1 %v497_v53, %s978_s6 }
 0x230   : > { %580 = vrot.lane.b32.xlu1 %v497_v53, %s976_s30 }
 0x25a   : > { %395 = vadd.xlane.f32.xlu1 %v394_v54  ;;  %v487_v54 = vld [vmem:[#allocation4 + $0x8] sm:$0xff] }
 0x282   : > { %v465_v60 = vpop.xlane.xlu1 %464 }
 0x283   : > { %v466_v61 = vmax.f32 %v462_v59, %v465_v60 }
 0x285   : > { %521 = vst.msk [vmem:[#allocation2 + $0x8] sm:$0xff] %vm333_vm1, %v466_v61  ;;  %472 = vperm.xlu2 %924, %v466_v61   ;;  %v467_v3 = vsub.f32 %v462_v59, %v466_v61  ;;  %v654_v61 = vld [vmem:[#allocation4 + $0x18] sm:$0xff] }
 0x287   : > { %v468_v4 = vmul.f32 1.442695, %v467_v3 }
 0x289   : > { %930 = vpow2.f32 %v468_v4 }
 0x28d   : > { %639 = vperm.xlu2 %924, %v633_v57  }
 0x28f   : > { %v931_v6 = vpop.eup %930 }
 0x290   : > { %v480_v46 = vmul.f32 %v931_v6, %v479_v45 }
 0x291   : > { %v550_v63 = vpop.xlane.xlu2 %549 }
 0x292   : > { %v551_v1 = vmax.f32 %v547_v62, %v550_v63 }
 0x294   : > { %v552_v2 = vsub.f32 %v547_v62, %v551_v1  ;;  %603 = vst.msk [vmem:[#allocation2 + $0x10] sm:$0xff] %vm333_vm1, %v551_v1  ;;  %557 = vperm.xlu0 %925, %v551_v1  }
 0x295   : > { %662 = vrot.lane.b32.xlu2 %v497_v53, %s977_s5 }
 0x296   : > { %v553_v35 = vmul.f32 1.442695, %v552_v2 }
 0x29a   : > { %v499_v7 = vpop.permute.xlu1 %498 }
 0x29b   : > { %v504_v10 = vsel %vm411_vm4, %v499_v7, 0 }
 0x29c   : > { %513 = vmatpush.bf16.msra.mxu3 %v504_v10  ;;  %v572_v10 = vld [vmem:[#allocation4 + $0x10] sm:$0xff] }
 0x29d   : > { %403 = vperm.xlu2 %924, %v929_v5   ;;  %v564_v5 = vld [vmem:[#allocation3 + $0x10] sm:$0xff] }
 0x2a2   : > { %v581_v8 = vpop.permute.xlu1 %580 }
 0x2a3   : > { %v586_v23 = vsel %vm411_vm4, %v581_v8, 0 }
 0x2a4   : > { %595 = vmatpush.bf16.msrb.mxu3 %v586_v23 }
 0x2a5   : > { %490 = vperm.xlu2 %924, %v931_v6  }
 0x2cd   : > { %v396_v12 = vpop.xlane.xlu1 %395 }
 0x2ce   : > { %v397_v13 = vadd.f32 %v396_v12, %v393_v11 }
 0x2d0   : > { %399 = vst.msk [vmem:[#allocation3] sm:$0xff] %vm333_vm1, %v397_v13 }
 0x2df   : > { %v473_v14 = vpop.permute.xlu2 %472 }
 0x2e0   : > { %v475_v15 = vsub.f32 %v460_v44, %v473_v14 }
 0x2e2   : > { %v476_v16 = vmul.f32 1.442695, %v475_v15 }
 0x2e4   : > { %932 = vpow2.f32 %v476_v16 }
 0x2e7   : > { %v640_v17 = vpop.permute.xlu2 %639 }
 0x2e8   : > { %v642_v18 = vsub.f32 %v1090_v39, %v640_v17 }
 0x2ea   : > { %v933_v19 = vpop.eup %932  ;;  %v643_v20 = vmul.f32 1.442695, %v642_v18 }
 0x2eb   : > { %v481_v21 = vsel %vm342_vm0, %v933_v19, 0.0  ;;  %v494_v22 = vpack.c.bf16 %v933_v19, %v933_v19 }
 0x2ec   : > { %934 = vpow2.f32 %v643_v20  ;;  %482 = vadd.xlane.f32.xlu0 %v481_v21 }
 0x2ed   : > { %883 = vmatmul.msk.bf16.vlgmr.msra.gmra.mxu3 %vm342_vm0, %v494_v22  ;;  %936 = vpow2.f32 %v635_v29 }
 0x2ee   : > { %938 = vpow2.f32 %v553_v35 }
 0x2ef   : > { %v663_v24 = vpop.permute.xlu2 %662 }
 0x2f0   : > { %v668_v25 = vsel %vm411_vm4, %v663_v24, 0 }
 0x2f1   : > { %677 = vmatpush.bf16.msrb.mxu2 %v668_v25 }
 0x2f2   : > { %v935_v26 = vpop.eup %934 }
 0x2f3   : > { %v648_v27 = vsel %vm342_vm0, %v935_v26, 0.0  ;;  %v661_v28 = vpack.c.bf16 %v935_v26, %v935_v26  ;;  %v937_v34 = vpop.eup %936 }
 0x2f4   : > { %649 = vadd.xlane.f32.xlu1 %v648_v27  ;;  %v939_v39 = vpop.eup %938 }
 0x2f5   : > { %887 = vmatmul.msk.bf16.vlgmr.msrb.gmra.mxu2 %vm342_vm0, %v661_v28  ;;  %v565_v6 = vmul.f32 %v939_v39, %v564_v5 }
 0x2f7   : > { %v404_v31 = vpop.permute.xlu2 %403 }
 0x2f8   : > { %v406_v32 = vmul.f32 %v404_v31, %v400_v30 }
 0x2fa   : > { %v428_v33 = vadd.f32 %v1094_v42, %v406_v32  ;;  %v689_v42 = vld [vmem:[#allocation3] sm:$0xff] }
 0x2fc   : > { %429 = vst.msk [vmem:[#allocation4] sm:$0xff] %vm342_vm0, %v428_v33 }
 0x2ff   : > { %v491_v55 = vpop.permute.xlu2 %490 }
 0x300   : > { %657 = vperm.xlu0 %925, %v937_v34   ;;  %v493_v56 = vmul.f32 %v491_v55, %v487_v54 }
 0x303   : > { %v691_v27 = vld [vmem:[#allocation4] sm:$0xff] }
 0x306   : > { %v558_v36 = vpop.permute.xlu0 %557 }
 0x307   : > { %v560_v37 = vsub.f32 %v1101_v49, %v558_v36  ;;  %v646_v49 = vld [vmem:[#allocation3 + $0x18] sm:$0xff] }
 0x308   : > { %v647_v50 = vmul.f32 %v937_v34, %v646_v49 }
 0x309   : > { %v561_v38 = vmul.f32 1.442695, %v560_v37 }
 0x30b   : > { %940 = vpow2.f32 %v561_v38 }
 0x30c   : > { %942 = vrcp.f32 %v689_v42 }
 0x30d   : > { %575 = vperm.xlu1 %923, %v939_v39  }
 0x311   : > { %v941_v40 = vpop.eup %940 }
 0x312   : > { %v566_v41 = vsel %vm342_vm0, %v941_v40, 0.0  ;;  %v579_v43 = vpack.c.bf16 %v941_v40, %v941_v40  ;;  %v943_v44 = vpop.eup %942 }
 0x313   : > { %567 = vadd.xlane.f32.xlu2 %v566_v41 }
 0x314   : > { %885 = vmatmul.msk.bf16.vlgmr.msrb.gmra.mxu3 %vm342_vm0, %v579_v43 }
 0x32b   : > { %694 = vperm.xlu2 %924, %v943_v44  }
 0x35f   : > { %v483_v47 = vpop.xlane.xlu0 %482 }
 0x360   : > { %v484_v48 = vadd.f32 %v483_v47, %v480_v46 }
 0x362   : > { %485 = vst.msk [vmem:[#allocation3 + $0x8] sm:$0xff] %vm333_vm1, %v484_v48 }
 0x367   : > { %v650_v51 = vpop.xlane.xlu1 %649 }
 0x368   : > { %v651_v52 = vadd.f32 %v650_v51, %v647_v50 }
 0x369   : > { %v698_v53 = vld [vmem:[#allocation3 + $0x8] sm:$0xff] }
 0x36a   : > { %652 = vst.msk [vmem:[#allocation3 + $0x18] sm:$0xff] %vm333_vm1, %v651_v52  ;;  %944 = vrcp.f32 %v698_v53 }
 0x370   : > { %v945_v57 = vpop.eup %944  ;;  %v515_v58 = vpop.f32.mrf.mxu3 }
 0x371   : > { %v519_v59 = vadd.f32 %v515_v58, %v493_v56  ;;  %703 = vperm.xlu0 %925, %v945_v57   ;;  %v716_v60 = vld [vmem:[#allocation3 + $0x18] sm:$0xff] }
 0x372   : > { %946 = vrcp.f32 %v716_v60  ;;  %v658_v62 = vpop.permute.xlu0 %657 }
 0x373   : > { %520 = vst.msk [vmem:[#allocation4 + $0x8] sm:$0xff] %vm342_vm0, %v519_v59  ;;  %v660_v63 = vmul.f32 %v658_v62, %v654_v61 }
 0x378   : > { %v947_v0 = vpop.eup %946  ;;  %v517_v1 = vpop.f32.mrf.mxu3 }
 0x379   : > { %v679_v2 = vpop.f32.mrf.mxu2  ;;  %721 = vperm.xlu0 %925, %v947_v0  }
 0x37a   : > { %v683_v3 = vadd.f32 %v679_v2, %v660_v63  ;;  %v700_v17 = vld [vmem:[#allocation4 + $0x8] sm:$0xff] }
 0x37c   : > { %684 = vst.msk [vmem:[#allocation4 + $0x18] sm:$0xff] %vm342_vm0, %v683_v3 }
 0x37f   : > { %v576_v11 = vpop.permute.xlu1 %575 }
 0x380   : > { %v578_v12 = vmul.f32 %v576_v11, %v572_v10 }
 0x381   : > { %v681_v4 = vpop.f32.mrf.mxu2 }
 0x383   : > { %v718_v20 = vld [vmem:[#allocation4 + $0x18] sm:$0xff] }
 0x386   : > { %v568_v7 = vpop.xlane.xlu2 %567 }
 0x387   : > { %v569_v8 = vadd.f32 %v568_v7, %v565_v6 }
 0x389   : > { %570 = vst.msk [vmem:[#allocation3 + $0x10] sm:$0xff] %vm333_vm1, %v569_v8 }
 0x38e   : > { %v695_v26 = vpop.permute.xlu2 %694 }
 0x38f   : > { %v697_v29 = vmul.f32 %v695_v26, %v691_v27 }
 0x390   : > { %v707_v9 = vld [vmem:[#allocation3 + $0x10] sm:$0xff] }
 0x391   : > { %948 = vrcp.f32 %v707_v9 }
 0x397   : > { %v949_v13 = vpop.eup %948  ;;  %v597_v14 = vpop.f32.mrf.mxu3 }
 0x398   : > { %v601_v15 = vadd.f32 %v597_v14, %v578_v12  ;;  %712 = vperm.xlu1 %923, %v949_v13  }
 0x39a   : > { %602 = vst.msk [vmem:[#allocation4 + $0x10] sm:$0xff] %vm342_vm0, %v601_v15 }
 0x39f   : > { %v599_v16 = vpop.f32.mrf.mxu3 }
 0x3a1   : > { %v709_v23 = vld [vmem:[#allocation4 + $0x10] sm:$0xff] }
 0x3e3   : > { %v704_v18 = vpop.permute.xlu0 %703 }
 0x3e4   : > { %v706_v19 = vmul.f32 %v704_v18, %v700_v17 }
 0x3e6   : > { %726 = vrot.lane.b32.xlu1 %v706_v19, %s980_s10 }
 0x3eb   : > { %v722_v21 = vpop.permute.xlu0 %721 }
 0x3ec   : > { %v724_v22 = vmul.f32 %v722_v21, %v718_v20 }
 0x3ee   : > { %734 = vrot.lane.b32.xlu0 %v724_v22, %s981_s11 }
 0x40a   : > { %v713_v24 = vpop.permute.xlu1 %712 }
 0x40b   : > { %v715_v25 = vmul.f32 %v713_v24, %v709_v23 }
 0x40d   : > { %730 = vrot.lane.b32.xlu2 %v715_v25, %s982_s12 }
 0x458   : > { %v727_v28 = vpop.permute.xlu1 %726 }
 0x459   : > { %v737_v30 = vsel %vm342_vm0, %v697_v29, %v727_v28 }
 0x460   : > { %v735_v32 = vpop.permute.xlu0 %734 }
 0x467   : > { %v731_v31 = vpop.permute.xlu2 %730 }
 0x468   : > { %v739_v33 = vsel %vm738_vm5, %v737_v30, %v731_v31 }
 0x469   : > { %v741_v34 = vsel %vm740_vm6, %v739_v33, %v735_v32 }
 0x46a   : > { %v742_v35 = vpack.c.bf16 %v741_v34, %v741_v34 }
 0x46c   : > { %744 = vst.msk [vmem:[%s325_s15] sm:$0xf] %vm743_vm7, %v742_v35 }
 0x46d PF: > { %s14_s17 = sadd.s32 1, %s972_s17   ;;  %s1156_s15 = smov %s968_s16 }
 0x46e   : > { %p11_p5 = scmp.ge.s32.totalorder %s14_s17, 4   ;;  %s1157_s16 = smov %s1159_s18 }
 0x470   :  { %13 = sbr.rel (!%p11_p5) target bundleno = 2 (0x2), region = 92 }

</bundles_post_ra>
